<compile_context>
chip_gen: v5e
topology: v5e:2x2
jax: 0.10.0
libtpu: 0.0.40
codegen_flags: <defaults>
</compile_context>

<pallas_src>
import math

import jax
import jax.numpy as jnp
from jax.experimental import pallas as pl
from jax.experimental.pallas import tpu as pltpu


def make_positional_encoding(d_model: int, max_len: int = 5000,
                             dtype=jnp.float32) -> jnp.ndarray:
    """Deterministic (max_len, d_model) sinusoidal buffer, mirroring the
    PyTorch __init__ (buffer setup = plain JAX glue, not kernel work)."""
    position = jnp.arange(max_len, dtype=jnp.float32)[:, None]            # (max_len, 1)
    div_term = jnp.exp(jnp.arange(0, d_model, 2, dtype=jnp.float32)
                       * -(math.log(10000.0) / d_model))                  # (d_model//2,)
    angles = position * div_term                                          # (max_len, d_model//2)
    pe = jnp.zeros((max_len, d_model), dtype=jnp.float32)
    pe = pe.at[:, 0::2].set(jnp.sin(angles))
    pe = pe.at[:, 1::2].set(jnp.cos(angles))
    return pe.astype(dtype)


def _pe_add_kernel(x_ref, pe_ref, o_ref):
    # x_ref: (tS, tB, tD), pe_ref: (tS, 1, tD) -> broadcast add over batch.
    # Pure VPU elementwise hot path; HBM-bandwidth bound.
    o_ref[...] = (x_ref[...] + pe_ref[...]).astype(o_ref.dtype)


def _largest_divisor(n: int, cap: int, multiple_of: int = 1):
    """Largest d with d | n, d % multiple_of == 0, d <= min(n, cap); None if none."""
    cap = min(cap, n)
    best = None
    d = multiple_of
    while d <= cap:
        if n % d == 0:
            best = d
        d += multiple_of
    return best


def _vmem_capacity_bytes() -> int:
    try:
        return int(pltpu.get_tpu_info().vmem_capacity_bytes)
    except Exception:
        return 64 * 1024 * 1024  # conservative per-TC fallback (v7x)


def positional_encoding_forward(x: jnp.ndarray, pe: jnp.ndarray, *,
                                target_tile_bytes: int | None = None,
                                donate_x: bool = False) -> jnp.ndarray:
    """x: (S, B, D); pe: (max_len, D). Returns x + pe[:S] broadcast over batch."""
    S, B, D = x.shape
    max_len, pe_d = pe.shape
    if pe_d != D:
        raise ValueError(f"pe d_model {pe_d} != x d_model {D}")
    if S > max_len:
        raise ValueError(f"sequence length {S} exceeds positional-encoding max_len {max_len}")

    itemsize = jnp.dtype(x.dtype).itemsize
    vmem_cap = _vmem_capacity_bytes()

    # Device-aware tile budget: ~capacity/8 so 4 double-buffered x tiles + pe
    # stay around half of scoped VMEM (v7x 64 MiB -> 8 MiB tiles; v5e/v6e
    # 128 MiB -> 16 MiB tiles).
    if target_tile_bytes is None:
        target_tile_bytes = int(min(16 << 20, max(2 << 20, vmem_cap // 8)))

    # --- batch tile: full batch if one seq row fits the budget, else the
    #     largest multiple-of-8 divisor of B that fits (keeps (tB, tD) legal).
    row_bytes = B * D * itemsize
    if row_bytes <= target_tile_bytes:
        tB = B
    else:
        cap_b = max(8, target_tile_bytes // max(D * itemsize, 1))
        tB = _largest_divisor(B, cap_b, multiple_of=8) or B

    # --- d_model tile: only when the batch axis couldn't bound the row
    #     (e.g. odd B with large B*D); tile D in multiples of 128.
    tD = D
    if tB * D * itemsize > target_tile_bytes and D % 128 == 0:
        cap_d = max(128, target_tile_bytes // max(tB * itemsize, 1))
        tD = _largest_divisor(D, cap_d, multiple_of=128) or D
    # If B % 8 != 0 and D % 128 != 0 we accept a large (1, B, D) row tile;
    # vmem_limit below is sized from the actual tiles.

    # --- seq tile: any divisor of S (leading block dim has no (8,128)
    #     constraint now that pe's 2nd-to-last block dim is 1).
    rows_budget = max(1, target_tile_bytes // max(tB * tD * itemsize, 1))
    tS = _largest_divisor(S, rows_budget, multiple_of=1) or 1

    # --- megacore: make sure the grid has >= 2 steps so v7x's two TCs both
    #     get work (harmless ~0.35us extra on single-TC chips).
    total_steps = (S // tS) * (D // tD) * (B // tB)
    if total_steps < 2 and S > 1:
        tS = _largest_divisor(S, max(1, S // 2), multiple_of=1) or 1

    # Grid order (seq, d, batch): batch innermost so the (tS, 1, tD) pe tile is
    # not re-DMA'd across batch steps.
    grid = (S // tS, D // tD, B // tB)

    # pe as (max_len, 1, D) in x's dtype: reshape is metadata-only, the cast is
    # one-time and halves pe DMA when x is bf16.
    pe_in = pe.reshape(max_len, 1, D).astype(x.dtype)

    # Scoped-VMEM: double-buffered x-in + out tiles, double-buffered pe tile,
    # plus slack; capped below physical VMEM so Mosaic keeps headroom.
    x_tile_bytes = tS * tB * tD * itemsize
    pe_tile_bytes = tS * tD * itemsize
    vmem_need = 4 * x_tile_bytes + 2 * pe_tile_bytes + (2 << 20)
    vmem_limit = int(min(max(vmem_need, 16 << 20), int(0.85 * vmem_cap)))

    cost = pl.CostEstimate(
        flops=S * B * D,
        transcendentals=0,
        bytes_accessed=2 * S * B * D * itemsize + S * D * itemsize,
    )

    return pl.pallas_call(
        _pe_add_kernel,
        out_shape=jax.ShapeDtypeStruct((S, B, D), x.dtype),
        grid=grid,
        in_specs=[
            # x: (tS, tB, tD) tile; tB is full-B or 8-aligned, tD is full-D or
            # 128-aligned, tS is a leading dim (unconstrained).
            pl.BlockSpec((tS, tB, tD), lambda s, d, b: (s, b, d)),
            # pe: addressed directly from the full (max_len, 1, D) buffer by
            # the seq/d block indices; ignores the batch axis -> VMEM-resident
            # across batch steps.
            pl.BlockSpec((tS, 1, tD), lambda s, d, b: (s, 0, d)),
        ],
        out_specs=pl.BlockSpec((tS, tB, tD), lambda s, d, b: (s, b, d)),
        compiler_params=pltpu.CompilerParams(
            dimension_semantics=("parallel", "parallel", "parallel"),
            vmem_limit_bytes=vmem_limit,
        ),
        cost_estimate=cost,
        input_output_aliases=({0: 0} if donate_x else {}),
    )(x, pe_in)


if __name__ == "__main__":
    # Small shapes consistent with the module's (S, B, D) forward contract.
    # D=128 keeps the trailing block dim lane-dense; a small tile budget forces
    # a multi-step seq grid so the tiled/pipelined path is exercised.
    S, B, D = 16, 2, 128
    MAX_LEN = 64

    key = jax.random.PRNGKey(0)
    x = jax.random.normal(key, (S, B, D), dtype=jnp.float32)

    pe = make_positional_encoding(D, max_len=MAX_LEN, dtype=jnp.float32)

    out = positional_encoding_forward(x, pe, target_tile_bytes=8 * 1024)
    out = jax.block_until_ready(out)

    # Reference check against plain-JAX semantics of the PyTorch forward.
    ref = x + pe[:S][:, None, :]
    assert out.shape == x.shape and out.dtype == x.dtype
    assert jnp.allclose(out, ref, atol=1e-6, rtol=1e-6)

    print("KERNEL_OK")
</pallas_src>

<mosaic_0001>
module attributes {stable_mosaic.version = 11 : i64} {
  func.func @_pe_add_kernel(%arg0: i32, %arg1: i32, %arg2: i32, %arg3: memref<8x2x128xf32, #tpu.memory_space<vmem>>, %arg4: memref<8x1x128xf32, #tpu.memory_space<vmem>>, %arg5: memref<8x2x128xf32, #tpu.memory_space<vmem>>) attributes {dimension_semantics = [#tpu.dimension_semantics<parallel>, #tpu.dimension_semantics<parallel>, #tpu.dimension_semantics<parallel>], iteration_bounds = array<i64: 2, 1, 1>, scalar_prefetch = 0 : i64, scratch_operands = 0 : i64, tpu.core_type = #tpu.core_type<tc>, window_params = [{transform_indices = @transform_0, window_bounds = array<i64: 8, 2, 128>}, {transform_indices = @transform_1, window_bounds = array<i64: 8, 1, 128>}, {transform_indices = @transform_2, window_bounds = array<i64: 8, 2, 128>}]} {
    %c0 = arith.constant 0 : index
    %c0_0 = arith.constant 0 : index
    %c0_1 = arith.constant 0 : index
    %0 = vector.load %arg3[%c0, %c0_0, %c0_1] : memref<8x2x128xf32, #tpu.memory_space<vmem>>, vector<8x2x128xf32>
    %c0_2 = arith.constant 0 : index
    %c0_3 = arith.constant 0 : index
    %c0_4 = arith.constant 0 : index
    %1 = vector.load %arg4[%c0_2, %c0_3, %c0_4] : memref<8x1x128xf32, #tpu.memory_space<vmem>>, vector<8x1x128xf32>
    %2 = vector.broadcast %1 : vector<8x1x128xf32> to vector<8x2x128xf32>
    %3 = arith.addf %0, %2 : vector<8x2x128xf32>
    %c0_5 = arith.constant 0 : index
    %c0_6 = arith.constant 0 : index
    %c0_7 = arith.constant 0 : index
    %4 = vector.load %arg5[%c0_5, %c0_6, %c0_7] : memref<8x2x128xf32, #tpu.memory_space<vmem>>, vector<8x2x128xf32>
    tpu.vector_store %arg5[%c0_5, %c0_6, %c0_7], %3 {strides = array<i32>} : memref<8x2x128xf32, #tpu.memory_space<vmem>>, vector<8x2x128xf32>,
    return
  }
  func.func @transform_0(%arg0: i32, %arg1: i32, %arg2: i32) -> (i32, i32, i32) {
    %c0_i32 = arith.constant 0 : i32
    return %arg0, %arg2, %arg1 : i32, i32, i32
  }
  func.func @transform_1(%arg0: i32, %arg1: i32, %arg2: i32) -> (i32, i32, i32) {
    %c0_i32 = arith.constant 0 : i32
    %c0_i32_0 = arith.constant 0 : i32
    return %arg0, %c0_i32, %arg1 : i32, i32, i32
  }
  func.func @transform_2(%arg0: i32, %arg1: i32, %arg2: i32) -> (i32, i32, i32) {
    %c0_i32 = arith.constant 0 : i32
    return %arg0, %arg2, %arg1 : i32, i32, i32
  }
}

</mosaic_0001>

<bundles_post_ra>
// kernel: tpu_custom_call.1
= control target key start
LH: loop header
LB: loop body
LE: loop exit
PB: predicated region body
PF: predicated region fallthrough
CT: control target
= control target key end

     0   :  { %s878_s0 = inlined_call_operand.hbm [shape: f32[16,2,128], index: 0, kind: input, shape index: {}]   ;;  %s879_s1 = inlined_call_operand.hbm [shape: f32[64,1,128], index: 1, kind: input, shape index: {}]   ;;  %s880_s2 = inlined_call_operand.hbm [shape: f32[16,2,128], index: 2, kind: output, shape index: {}]  }
   0x1   :  { %881 = sst [smem:[#allocation11_spill]] %s878_s0 }
   0x2   :  { %7 = vsyncpa [#allocation3], 0 }
   0x3   :  { %9 = vsyncpa [#allocation3 + $0x1], 0 }
   0x4   :  { %10 = vsyncpa [#allocation6], 0 }
   0x5   :  { %12 = vsyncpa [#allocation6 + $0x1], 0 }
   0x6   :  { %13 = vsyncpa [#allocation4], 0 }
   0x7   :  { %15 = vsyncpa [#allocation4 + $0x1], 0  ;;  %s698_s9 = smov 0   ;;  %s700_s10 = smov 0  }
   0x8   :  { %s702_s11 = smov 0   ;;  %s704_s12 = smov 0  }
   0x9   :  { %s706_s13 = smov 0   ;;  %s708_s14 = smov 0  }
   0xa LB: > { %s428_s15 = sadd.s32 4294967295, %s675_s14   ;;  %s429_s16 = sadd.s32 4294967294, %s675_s14   ;;  %s675_s14 = sphi %s708_s14, %s21_s14   ;;  %s671_s13 = sphi %s706_s13, %s892_s13   ;;  %s667_s12 = sphi %s704_s12, %s891_s12   ;;  %s663_s11 = sphi %s702_s11, %s890_s11   ;;  %s659_s10 = sphi %s700_s10, %s889_s10   ;;  %s655_s9 = sphi %s698_s9, %s888_s9  }
   0xb   : > { %s40_s17 = sadd.s32 1, %s671_s13  ;;  %s51_s18 = sadd.s32 1, %s663_s11 }
   0xc   : > { %p42_p0 = scmp.ge.s32.totalorder %s40_s17, 2  ;;  %p58_p1 = scmp.ne.s32.totalorder %s663_s11, %s659_s10 }
   0xd   : > { %p59_p2 = scmp.eq.s32.totalorder %s675_s14, 0  ;;  %p64_p3 = scmp.ne.s32.totalorder %s659_s10, %s655_s9 }
   0xe   : > { %s894_s17 = smov (%p42_p0, %s40_s17), 0  ;;  %p65_p5 = scmp.eq.s32.totalorder %s428_s15, 0 }
   0xf   : > { %p739_p4 = por %p59_p2, %p58_p1  ;;  %s44_s20 = ssub.s32 %s671_s13, %s894_s17 }
  0x10   : > { %p120_p6 = scmp.eq.s32.totalorder %s428_s15, 1  ;;  %p49_p7 = scmp.eq.s32.totalorder %s44_s20, 0 }
  0x11   : > { %p745_p8 = por %p65_p5, %p64_p3  ;;  %p126_p10 = scmp.eq.s32.totalorder %s429_s16, 1 }
  0x12   : > { %p749_p9 = por %p120_p6, %p58_p1  ;;  %p431_p12 = scmp.ge.s32.totalorder %s675_s14, 2 }
  0x13   : > { %s754_s23 = scalar_select %p49_p7, %s663_s11, %s51_s18  }
  0x14   : > { %p756_p11 = por %p126_p10, %p64_p3  ;;  %p465_p13 = scmp.lt.s32.totalorder %s675_s14, 2 }
  0x15   : > { %s763_s25 = sand.u32 1, %s663_s11   ;;  %s446_s27 = sshll.u32 %s671_s13, 4 }
  0x16   : > { %s432_s26 = sshll.u32 %s763_s25, 4  ;;  %s886_s0 = sld [smem:[#allocation11_spill]] }
  0x17   : > { %s150_s3 = scalar_lea.vmem [#allocation2], %s432_s26  ;;  %p772_p0 = pnand %p465_p13, %p739_p4 }
  0x18   : > { %s160_s4 = sshll.u32 %s150_s3, 4  ;;  %p437_p1 = scmp.ge.s32.totalorder %s675_s14, 1  ;;  %s161_s4 = int_to_ptr.vmem [resolvable:$true] %s160_s4 }
  0x19   : > { %s147_s7 = scalar_lea.sflag [#allocation3], %s763_s25  ;;  %s677_s8 = smov 32  }
  0x1a   : > { %s678_s15 = smov 2   ;;  %p190_p2 = scmp.lt.s32.totalorder %s675_s14, 3 }
  0x1b   : > { %s435_s16 = sshll.u32 %s763_s25, 3  ;;  %s436_s18 = sshll.u32 %s671_s13, 3 }
  0x1c   : > { %s157_s30 = scalar_lea.hbm %s886_s0, %s446_s27  ;;  %p191_p3 = pnand %p437_p1, %p190_p2 }
  0x1d   : > { %s158_s5 = sshll.u32 %s157_s30, 4  ;;  %s179_s19 = scalar_lea.hbm %s879_s1, %s436_s18  ;;  %s159_s5 = int_to_ptr.hbm [resolvable:$true] %s158_s5 }
  0x1e   : > { %457 = dma.hbm_to_vmem [thread:$0]  (!%p772_p0), %s159_s5, 256, %s161_s4, %s147_s7, %s677_s8, %s677_s8, %s678_s15  }
  0x1f   : > { %s174_s27 = scalar_lea.vmem [#allocation5], %s435_s16  ;;  %s180_s29 = sshll.u32 %s179_s19, 4  ;;  %s181_s29 = int_to_ptr.hbm [resolvable:$true] %s180_s29 }
  0x20   : > { %s182_s28 = sshll.u32 %s174_s27, 4  ;;  %s171_s30 = scalar_lea.sflag [#allocation6], %s763_s25  ;;  %s183_s28 = int_to_ptr.vmem [resolvable:$true] %s182_s28 }
  0x21   : > { %s679_s3 = smov 16   ;;  %s680_s0 = smov 1  }
  0x22   : > { %460 = dma.hbm_to_vmem [thread:$0]  (!%p772_p0), %s181_s29, 128, %s183_s28, %s171_s30, %s679_s3, %s679_s3, %s680_s0  }
  0x23   : > { %194 = sbr.rel (%p191_p3) target bundleno = 64 (0x40), region = 28  ;;  %s790_s4 = sand.u32 (!%p191_p3), 1, %s659_s10  }
  0x24   : > { %s438_s5 = sshll.u32 (!%p191_p3), %s790_s4, 4  ;;  %s197_s7 = scalar_lea.sflag (!%p191_p3), [#allocation3], %s790_s4 }
  0x25   : > { %s794_s8 = scalar_lea.vmem (!%p191_p3), [#allocation2], %s438_s5 }
  0x28   : > { %642 = dma.done.wait (%p745_p8), %s197_s7, 256  }
  0x29   : > { %644 = vsyncadd (%p745_p8), %s197_s7, 4294967040  ;;  %s439_s0 = sshll.u32 %s790_s4, 3  ;;  %s207_s25 = scalar_lea.sflag [#allocation6], %s790_s4 }
  0x2a   : > { %s802_s6 = scalar_lea.vmem [#allocation5], %s439_s0 }
  0x2b   : > { %646 = dma.done.wait (%p745_p8), %s207_s25, 128  }
  0x2c   : > { %648 = vsyncadd (%p745_p8), %s207_s25, 4294967168  ;;  %s447_s15 = sshll.u32 %s667_s12, 4  ;;  %s809_s16 = scalar_lea.vmem [#allocation7], %s438_s5  ;;  %v240_v0 = vld [vmem:[%s794_s8] sm:$0x3] }
  0x2d   : > { %s311_s18 = sshll.u32 %s809_s16, 4  ;;  %v521_v1 = vld [vmem:[%s802_s6] ss:$0 sm:$0xff]  ;;  %v241_v2 = vld [vmem:[%s794_s8 + $0x2] sm:$0x3]  ;;  %s819_s26 = scalar_lea.hbm %s880_s2, %s447_s15  ;;  %s312_s18 = int_to_ptr.vmem [resolvable:$true] %s311_s18 }
  0x2e   : > { %v522_v3 = vld [vmem:[%s802_s6 + $0x1] ss:$0 sm:$0xff]  ;;  %v280_v4 = vadd.f32 %v521_v1, %v240_v0  ;;  %v242_v5 = vld [vmem:[%s794_s8 + $0x4] sm:$0x3]  ;;  %v523_v6 = vld [vmem:[%s802_s6 + $0x2] ss:$0 sm:$0xff] }
  0x2f   : > { %v281_v7 = vadd.f32 %v522_v3, %v241_v2  ;;  %v243_v8 = vld [vmem:[%s794_s8 + $0x6] sm:$0x3]  ;;  %v524_v9 = vld [vmem:[%s802_s6 + $0x3] ss:$0 sm:$0xff]  ;;  %v282_v10 = vadd.f32 %v523_v6, %v242_v5  ;;  %v244_v11 = vld [vmem:[%s794_s8 + $0x8] sm:$0x3] }
  0x30   : > { %288 = vst [vmem:[%s809_s16] sm:$0x3] %v280_v4  ;;  %s313_s12 = sshll.u32 %s819_s26, 4  ;;  %v283_v12 = vadd.f32 %v524_v9, %v243_v8  ;;  %v525_v13 = vld [vmem:[%s802_s6 + $0x4] ss:$0 sm:$0xff]  ;;  %v245_v14 = vld [vmem:[%s794_s8 + $0xa] sm:$0x3]  ;;  %s314_s12 = int_to_ptr.hbm [resolvable:$true] %s313_s12 }
  0x31   : > { %289 = vst [vmem:[%s809_s16 + $0x2] sm:$0x3] %v281_v7  ;;  %v526_v15 = vld [vmem:[%s802_s6 + $0x5] ss:$0 sm:$0xff]  ;;  %v284_v16 = vadd.f32 %v525_v13, %v244_v11  ;;  %v246_v17 = vld [vmem:[%s794_s8 + $0xc] sm:$0x3] }
  0x32   : > { %290 = vst [vmem:[%s809_s16 + $0x4] sm:$0x3] %v282_v10  ;;  %v285_v18 = vadd.f32 %v526_v15, %v245_v14  ;;  %v527_v19 = vld [vmem:[%s802_s6 + $0x6] ss:$0 sm:$0xff]  ;;  %v247_v20 = vld [vmem:[%s794_s8 + $0xe] sm:$0x3] }
  0x33   : > { %291 = vst [vmem:[%s809_s16 + $0x6] sm:$0x3] %v283_v12  ;;  %v528_v21 = vld [vmem:[%s802_s6 + $0x7] ss:$0 sm:$0xff]  ;;  %v286_v22 = vadd.f32 %v527_v19, %v246_v17  ;;  %s297_s19 = scalar_lea.sflag [#allocation4], %s790_s4  ;;  %s603_s27 = sshra.s32 %s314_s12, 4  ;;  %s604_s27 = int_to_ptr.hbm [resolvable:$true] %s603_s27 }
  0x34   : > { %292 = vst [vmem:[%s809_s16 + $0x8] sm:$0x3] %v284_v16  ;;  %v287_v23 = vadd.f32 %v528_v21, %v247_v20  ;;  %s605_s28 = scalar_lea.hbm %s604_s27, 16  ;;  %s609_s3 = scalar_lea.hbm %s880_s2, 32 }
  0x35   : > { %293 = vst [vmem:[%s809_s16 + $0xa] sm:$0x3] %v285_v18  ;;  %p606_p4 = scmp.ne.s32.totalorder %s604_s27, %s605_s28  ;;  %p610_p7 = scmp.lt.s32.totalorder %s604_s27, %s880_s2 }
  0x36   : > { %294 = vst [vmem:[%s809_s16 + $0xc] sm:$0x3] %v286_v22  ;;  %p611_p8 = scmp.lt.s32.totalorder %s609_s3, %s605_s28 }
  0x37   : > { %295 = vst [vmem:[%s809_s16 + $0xe] sm:$0x3] %v287_v23  ;;  %p607_p5 = pnand %p606_p4, %p749_p9 }
  0x38   : > { %p612_p10 = por %p611_p8, %p610_p7 }
  0x39   : > { %p608_p6 = pneg %p607_p5 }
  0x3b   : > { %p613_p13 = pnand %p612_p10, %p608_p6 }
  0x3d   : > { %616 = shalt.err (!%p613_p13)
}
  0x3e   : > { %s681_s4 = smov 32   ;;  %s682_s8 = smov 2  }
  0x3f   : > { %452 = dma.vmem_to_hbm [thread:$0]  (%p749_p9), %s312_s18, 256, %s314_s12, %s297_s19, %s681_s4, %s681_s4, %s682_s8  }
  0x40 PF: > { %s328_s0 = sand.u32 1, %s655_s9   ;;  %p462_p0 = pnand %p431_p12, %p756_p11 }
  0x41   : > { %s329_s25 = scalar_lea.sflag [#allocation4], %s328_s0 }
  0x42   : > { %p463_p1 = pneg %p462_p0 }
  0x44   : > { %650 = dma.done.wait (%p463_p1), %s329_s25, 256  }
  0x45   : > { %652 = vsyncadd (%p463_p1), %s329_s25, 4294967040  ;;  %s21_s14 = sadd.s32 1, %s675_s14   ;;  %s888_s9 = smov %s659_s10 }
  0x46   : > { %p18_p2 = scmp.ge.s32.totalorder %s21_s14, 4   ;;  %s889_s10 = smov %s663_s11 }
  0x47   : > { %s890_s11 = smov %s754_s23  ;;  %s891_s12 = smov %s671_s13 }
  0x48   : > { %s892_s13 = smov %s894_s17  ;;  %20 = sbr.rel (!%p18_p2) target bundleno = 10 (0xa), region = 86 }
  0x4d   :  { %335 = vsyncpa [#allocation3], 1 }
  0x4e   :  { %337 = vsyncpa [#allocation3 + $0x1], 1 }
  0x4f   :  { %338 = vsyncpa [#allocation6], 1 }
  0x50   :  { %340 = vsyncpa [#allocation6 + $0x1], 1 }
  0x51   :  { %341 = vsyncpa [#allocation4], 1 }
  0x52   :  { %343 = vsyncpa [#allocation4 + $0x1], 1 }

</bundles_post_ra>
